<compile_context>
chip_gen: v7x
topology: tpu7x:2x2x1
jax: 0.10.0
libtpu: 0.0.40
codegen_flags: <defaults>
</compile_context>

<pallas_src>
from functools import partial

import jax
import jax.numpy as jnp
from jax import lax
from jax.experimental import pallas as pl
from jax.experimental.pallas import tpu as pltpu


def _cross_modal_kernel(xq_ref, xk_ref, o_ref, row_acc, diag_acc, *,
                        inv_temp, bs, tq, tk):
    qi = pl.program_id(0)   # query-tile index ("parallel")
    ki = pl.program_id(1)   # key-tile index   ("arbitrary", innermost)

    @pl.when(ki == 0)
    def _():
        row_acc[...] = jnp.zeros_like(row_acc)
        diag_acc[...] = jnp.zeros_like(diag_acc)

    xq = xq_ref[...].astype(jnp.float32)          # (tq, D)
    xk = xk_ref[...].astype(jnp.float32)          # (tk, D)

    # F.normalize(x, p=2, dim=1) == x * rsqrt(max(sum(x^2), eps^2)), eps=1e-12
    qn = xq * lax.rsqrt(jnp.maximum(jnp.sum(xq * xq, axis=1, keepdims=True), 1e-24))
    kn = xk * lax.rsqrt(jnp.maximum(jnp.sum(xk * xk, axis=1, keepdims=True), 1e-24))

    # sim tile = exp((qn . kn^T) / temp): contract on D for both operands (MXU),
    # then one multiply by 1/temp feeding the EUP exp.
    s = lax.dot_general(qn, kn, (((1,), (1,)), ((), ())),
                        preferred_element_type=jnp.float32)
    sim = jnp.exp(s * inv_temp)                   # (tq, tk)

    # Global row / col indices as cheap vectors (no (N,N) iotas, no N^2 rem).
    r = qi * tq + lax.broadcasted_iota(jnp.int32, (tq, 1), 0)
    c = ki * tk + lax.broadcasted_iota(jnp.int32, (1, tk), 1)

    # sim = sim - sim.diag().diag(): zero the main diagonal.
    sim = jnp.where(r == c, jnp.float32(0.0), sim)

    # sim.sum(1) accumulation.
    row_acc[...] += jnp.sum(sim, axis=1, keepdims=True)

    # diag1[i] = sum_v sim[i, v*bs + (i % bs)]  (block-diagonal gather via mask;
    # no separate sim*mask buffer is materialized).
    same = lax.rem(r, bs) == lax.rem(c, bs)
    diag_acc[...] += jnp.sum(jnp.where(same, sim, jnp.float32(0.0)),
                             axis=1, keepdims=True)

    @pl.when(ki == pl.num_programs(1) - 1)
    def _():
        # Per-row log(diag1 / sim.sum(1)); the mean / sign / factor 2 is done
        # in the wrapper.
        o_ref[...] = jnp.log(diag_acc[...]) - jnp.log(row_acc[...])


def _pick_tile(n, max_tile):
    """Largest tile <= max_tile that divides n and keeps (8,*) alignment."""
    if n <= max_tile:
        return n
    for t in range(max_tile, 0, -1):
        if n % t == 0 and t % 8 == 0:
            return t
    return n  # fallback: single block along this axis


def cross_modal_loss(x, temp=0.22, modal_num=2, max_tile=256):
    """Pallas TPU forward of CrossModalLoss (returns a scalar f32 loss)."""
    n, d = x.shape
    assert n % modal_num == 0, "rows must be modal_num * batch_size"
    # NOTE: modal_num == 1 yields log(0) = -inf, inherited from the PyTorch
    # module's semantics (diag1 is the removed diagonal in that case).
    bs = n // modal_num
    tq = _pick_tile(n, max_tile)
    tk = _pick_tile(n, max_tile)

    kernel = partial(_cross_modal_kernel,
                     inv_temp=1.0 / temp, bs=bs, tq=tq, tk=tk)

    per_row = pl.pallas_call(
        kernel,
        out_shape=jax.ShapeDtypeStruct((n, 1), jnp.float32),
        grid_spec=pltpu.PrefetchScalarGridSpec(
            num_scalar_prefetch=0,
            grid=(n // tq, n // tk),
            in_specs=[
                pl.BlockSpec((tq, d), lambda i, k: (i, 0)),   # query rows of x
                pl.BlockSpec((tk, d), lambda i, k: (k, 0)),   # key rows of x
            ],
            out_specs=pl.BlockSpec((tq, 1), lambda i, k: (i, 0)),
            scratch_shapes=[
                pltpu.VMEM((tq, 1), jnp.float32),   # row_sum accumulator
                pltpu.VMEM((tq, 1), jnp.float32),   # diag1 accumulator
            ],
        ),
        compiler_params=pltpu.CompilerParams(
            dimension_semantics=("parallel", "arbitrary"),
            vmem_limit_bytes=48 * 1024 * 1024,
        ),
    )(x, x)

    # loss1 = -mean(log(diag1 / sim.sum(1))).  By symmetry of sim and the mask,
    # loss2 == loss1, so the module's loss1 + loss2 == 2 * loss1.
    return -2.0 * jnp.mean(per_row[:, 0])


def _reference_loss(x, temp=0.22, modal_num=2):
    # Pure-JAX mirror of the PyTorch forward, for the correctness check.
    x = x.astype(jnp.float32)
    n = x.shape[0]
    bs = n // modal_num
    xn = x / jnp.maximum(jnp.linalg.norm(x, axis=1, keepdims=True), 1e-12)
    sim = jnp.exp((xn @ xn.T) / temp)
    sim = sim - jnp.diag(jnp.diag(sim))
    sim_sum1 = sum(sim[:, v * bs:(v + 1) * bs] for v in range(modal_num))
    diag1 = jnp.concatenate(
        [jnp.diag(sim_sum1[v * bs:(v + 1) * bs]) for v in range(modal_num)])
    loss1 = -jnp.mean(jnp.log(diag1 / sim.sum(1)))
    sim_sum2 = sum(sim[v * bs:(v + 1) * bs] for v in range(modal_num))
    diag2 = jnp.concatenate(
        [jnp.diag(sim_sum2[:, v * bs:(v + 1) * bs]) for v in range(modal_num)])
    loss2 = -jnp.mean(jnp.log(diag2 / sim.sum(1)))
    return loss1 + loss2


if __name__ == "__main__":
    # Small case consistent with the module: modal_num=2, batch=8 -> N=16, D=32.
    key = jax.random.PRNGKey(0)
    x_small = jax.random.normal(key, (16, 32), dtype=jnp.float32)
    out_small = jax.block_until_ready(cross_modal_loss(x_small, temp=0.22, modal_num=2))
    ref_small = _reference_loss(x_small, temp=0.22, modal_num=2)
    assert jnp.isfinite(out_small), "kernel produced non-finite loss"
    assert jnp.allclose(out_small, ref_small, rtol=1e-4, atol=1e-4), (out_small, ref_small)

    # Multi-tile case exercising the (query, key) grid and accumulators:
    # N=512, D=128 with 128-wide tiles -> 4 x 4 grid.
    x_big = jax.random.normal(jax.random.PRNGKey(1), (512, 128), dtype=jnp.float32)
    out_big = jax.block_until_ready(
        cross_modal_loss(x_big, temp=0.22, modal_num=2, max_tile=128))
    ref_big = _reference_loss(x_big, temp=0.22, modal_num=2)
    assert jnp.isfinite(out_big), "kernel produced non-finite loss (tiled)"
    assert jnp.allclose(out_big, ref_big, rtol=2e-4, atol=2e-4), (out_big, ref_big)

    print("KERNEL_OK")
</pallas_src>

<mosaic_0001>
module attributes {stable_mosaic.version = 11 : i64} {
  func.func @_cross_modal_kernel(%arg0: i32, %arg1: i32, %arg2: memref<16x32xf32, #tpu.memory_space<vmem>>, %arg3: memref<16x32xf32, #tpu.memory_space<vmem>>, %arg4: memref<16x1xf32, #tpu.memory_space<vmem>>, %arg5: memref<16x1xf32, #tpu.memory_space<vmem>>, %arg6: memref<16x1xf32, #tpu.memory_space<vmem>>) attributes {dimension_semantics = [#tpu.dimension_semantics<parallel>, #tpu.dimension_semantics<arbitrary>], iteration_bounds = array<i64: 1, 1>, scalar_prefetch = 0 : i64, scratch_operands = 2 : i64, tpu.core_type = #tpu.core_type<tc>, window_params = [{transform_indices = @transform_0, window_bounds = array<i64: 16, 32>}, {transform_indices = @transform_1, window_bounds = array<i64: 16, 32>}, {transform_indices = @transform_2, window_bounds = array<i64: 16, 1>}]} {
    %c0_i32 = arith.constant 0 : i32
    %0 = arith.cmpi eq, %arg1, %c0_i32 : i32
    %1 = arith.extui %0 : i1 to i32
    %c0_i32_0 = arith.constant 0 : i32
    %2 = arith.cmpi ne, %1, %c0_i32_0 : i32
    scf.if %2 {
      %cst_25 = arith.constant 0.000000e+00 : f32
      %60 = vector.broadcast %cst_25 : f32 to vector<16x1xf32>
      %c0_26 = arith.constant 0 : index
      %c0_27 = arith.constant 0 : index
      %61 = vector.load %arg5[%c0_26, %c0_27] : memref<16x1xf32, #tpu.memory_space<vmem>>, vector<16x1xf32>
      tpu.vector_store %arg5[%c0_26, %c0_27], %60 {strides = array<i32>} : memref<16x1xf32, #tpu.memory_space<vmem>>, vector<16x1xf32>,
      %cst_28 = arith.constant 0.000000e+00 : f32
      %62 = vector.broadcast %cst_28 : f32 to vector<16x1xf32>
      %c0_29 = arith.constant 0 : index
      %c0_30 = arith.constant 0 : index
      %63 = vector.load %arg6[%c0_29, %c0_30] : memref<16x1xf32, #tpu.memory_space<vmem>>, vector<16x1xf32>
      tpu.vector_store %arg6[%c0_29, %c0_30], %62 {strides = array<i32>} : memref<16x1xf32, #tpu.memory_space<vmem>>, vector<16x1xf32>,
    } else {
    }
    %c0 = arith.constant 0 : index
    %c0_1 = arith.constant 0 : index
    %3 = vector.load %arg2[%c0, %c0_1] : memref<16x32xf32, #tpu.memory_space<vmem>>, vector<16x32xf32>
    %c0_2 = arith.constant 0 : index
    %c0_3 = arith.constant 0 : index
    %4 = vector.load %arg3[%c0_2, %c0_3] : memref<16x32xf32, #tpu.memory_space<vmem>>, vector<16x32xf32>
    %5 = arith.mulf %3, %3 : vector<16x32xf32>
    %cst = arith.constant dense<0.000000e+00> : vector<16xf32>
    %6 = vector.multi_reduction <add>, %5, %cst [1] : vector<16x32xf32> to vector<16xf32>
    %7 = vector.shape_cast %6 : vector<16xf32> to vector<16x1xf32>
    %cst_4 = arith.constant 1.000000e-24 : f32
    %8 = vector.broadcast %cst_4 : f32 to vector<16x1xf32>
    %9 = arith.maximumf %7, %8 : vector<16x1xf32>
    %10 = math.rsqrt %9 : vector<16x1xf32>
    %11 = vector.broadcast %10 : vector<16x1xf32> to vector<16x32xf32>
    %12 = arith.mulf %3, %11 : vector<16x32xf32>
    %13 = arith.mulf %4, %4 : vector<16x32xf32>
    %cst_5 = arith.constant dense<0.000000e+00> : vector<16xf32>
    %14 = vector.multi_reduction <add>, %13, %cst_5 [1] : vector<16x32xf32> to vector<16xf32>
    %15 = vector.shape_cast %14 : vector<16xf32> to vector<16x1xf32>
    %cst_6 = arith.constant 1.000000e-24 : f32
    %16 = vector.broadcast %cst_6 : f32 to vector<16x1xf32>
    %17 = arith.maximumf %15, %16 : vector<16x1xf32>
    %18 = math.rsqrt %17 : vector<16x1xf32>
    %19 = vector.broadcast %18 : vector<16x1xf32> to vector<16x32xf32>
    %20 = arith.mulf %4, %19 : vector<16x32xf32>
    %cst_7 = arith.constant dense<0.000000e+00> : vector<16x16xf32>
    %21 = tpu.matmul %12, %20, %cst_7 {dimension_numbers = #tpu.dot_dimension_numbers<[1], [1], [0], [0], [0, 0, 1, 0], [], []>} : vector<16x32xf32>, vector<16x32xf32>, vector<16x16xf32> -> vector<16x16xf32>
    %cst_8 = arith.constant 4.5454545 : f32
    %22 = vector.broadcast %cst_8 : f32 to vector<16x16xf32>
    %23 = arith.mulf %21, %22 : vector<16x16xf32>
    %24 = math.exp %23 : vector<16x16xf32>
    %c16_i32 = arith.constant 16 : i32
    %25 = arith.muli %arg0, %c16_i32 : i32
    %26 = tpu.iota {dimensions = array<i32: 0>} : vector<16x1xi32>
    %27 = vector.broadcast %25 : i32 to vector<16x1xi32>
    %28 = arith.addi %27, %26 : vector<16x1xi32>
    %c16_i32_9 = arith.constant 16 : i32
    %29 = arith.muli %arg1, %c16_i32_9 : i32
    %30 = tpu.iota {dimensions = array<i32: 1>} : vector<1x16xi32>
    %31 = vector.broadcast %29 : i32 to vector<1x16xi32>
    %32 = arith.addi %31, %30 : vector<1x16xi32>
    %33 = vector.broadcast %28 : vector<16x1xi32> to vector<16x16xi32>
    %34 = vector.broadcast %32 : vector<1x16xi32> to vector<16x16xi32>
    %35 = arith.cmpi eq, %33, %34 : vector<16x16xi32>
    %cst_10 = arith.constant 0.000000e+00 : f32
    %36 = vector.broadcast %cst_10 : f32 to vector<16x16xf32>
    %37 = arith.select %35, %36, %24 : vector<16x16xi1>, vector<16x16xf32>
    %c0_11 = arith.constant 0 : index
    %c0_12 = arith.constant 0 : index
    %38 = vector.load %arg5[%c0_11, %c0_12] : memref<16x1xf32, #tpu.memory_space<vmem>>, vector<16x1xf32>
    %cst_13 = arith.constant dense<0.000000e+00> : vector<16xf32>
    %39 = vector.multi_reduction <add>, %37, %cst_13 [1] : vector<16x16xf32> to vector<16xf32>
    %40 = vector.shape_cast %39 : vector<16xf32> to vector<16x1xf32>
    %41 = arith.addf %38, %40 : vector<16x1xf32>
    %c0_14 = arith.constant 0 : index
    %c0_15 = arith.constant 0 : index
    %42 = vector.load %arg5[%c0_14, %c0_15] : memref<16x1xf32, #tpu.memory_space<vmem>>, vector<16x1xf32>
    tpu.vector_store %arg5[%c0_14, %c0_15], %41 {strides = array<i32>} : memref<16x1xf32, #tpu.memory_space<vmem>>, vector<16x1xf32>,
    %c8_i32 = arith.constant 8 : i32
    %43 = vector.broadcast %c8_i32 : i32 to vector<16x1xi32>
    %44 = arith.remsi %28, %43 : vector<16x1xi32>
    %c8_i32_16 = arith.constant 8 : i32
    %45 = vector.broadcast %c8_i32_16 : i32 to vector<1x16xi32>
    %46 = arith.remsi %32, %45 : vector<1x16xi32>
    %47 = vector.broadcast %44 : vector<16x1xi32> to vector<16x16xi32>
    %48 = vector.broadcast %46 : vector<1x16xi32> to vector<16x16xi32>
    %49 = arith.cmpi eq, %47, %48 : vector<16x16xi32>
    %c0_17 = arith.constant 0 : index
    %c0_18 = arith.constant 0 : index
    %50 = vector.load %arg6[%c0_17, %c0_18] : memref<16x1xf32, #tpu.memory_space<vmem>>, vector<16x1xf32>
    %cst_19 = arith.constant 0.000000e+00 : f32
    %51 = vector.broadcast %cst_19 : f32 to vector<16x16xf32>
    %52 = arith.select %49, %37, %51 : vector<16x16xi1>, vector<16x16xf32>
    %cst_20 = arith.constant dense<0.000000e+00> : vector<16xf32>
    %53 = vector.multi_reduction <add>, %52, %cst_20 [1] : vector<16x16xf32> to vector<16xf32>
    %54 = vector.shape_cast %53 : vector<16xf32> to vector<16x1xf32>
    %55 = arith.addf %50, %54 : vector<16x1xf32>
    %c0_21 = arith.constant 0 : index
    %c0_22 = arith.constant 0 : index
    %56 = vector.load %arg6[%c0_21, %c0_22] : memref<16x1xf32, #tpu.memory_space<vmem>>, vector<16x1xf32>
    tpu.vector_store %arg6[%c0_21, %c0_22], %55 {strides = array<i32>} : memref<16x1xf32, #tpu.memory_space<vmem>>, vector<16x1xf32>,
    %c0_i32_23 = arith.constant 0 : i32
    %57 = arith.cmpi eq, %arg1, %c0_i32_23 : i32
    %58 = arith.extui %57 : i1 to i32
    %c0_i32_24 = arith.constant 0 : i32
    %59 = arith.cmpi ne, %58, %c0_i32_24 : i32
    scf.if %59 {
      %c0_25 = arith.constant 0 : index
      %c0_26 = arith.constant 0 : index
      %60 = vector.load %arg6[%c0_25, %c0_26] : memref<16x1xf32, #tpu.memory_space<vmem>>, vector<16x1xf32>
      %61 = math.log %60 : vector<16x1xf32>
      %c0_27 = arith.constant 0 : index
      %c0_28 = arith.constant 0 : index
      %62 = vector.load %arg5[%c0_27, %c0_28] : memref<16x1xf32, #tpu.memory_space<vmem>>, vector<16x1xf32>
      %63 = math.log %62 : vector<16x1xf32>
      %64 = arith.subf %61, %63 : vector<16x1xf32>
      %c0_29 = arith.constant 0 : index
      %c0_30 = arith.constant 0 : index
      %65 = vector.load %arg4[%c0_29, %c0_30] : memref<16x1xf32, #tpu.memory_space<vmem>>, vector<16x1xf32>
      tpu.vector_store %arg4[%c0_29, %c0_30], %64 {strides = array<i32>} : memref<16x1xf32, #tpu.memory_space<vmem>>, vector<16x1xf32>,
    } else {
    }
    return
  }
  func.func @transform_0(%arg0: i32, %arg1: i32) -> (i32, i32) {
    %c0_i32 = arith.constant 0 : i32
    %c0_i32_0 = arith.constant 0 : i32
    return %arg0, %c0_i32 : i32, i32
  }
  func.func @transform_1(%arg0: i32, %arg1: i32) -> (i32, i32) {
    %c0_i32 = arith.constant 0 : i32
    %c0_i32_0 = arith.constant 0 : i32
    return %arg1, %c0_i32 : i32, i32
  }
  func.func @transform_2(%arg0: i32, %arg1: i32) -> (i32, i32) {
    %c0_i32 = arith.constant 0 : i32
    %c0_i32_0 = arith.constant 0 : i32
    return %arg0, %c0_i32 : i32, i32
  }
}

</mosaic_0001>

<bundles_post_ra>
// kernel: tpu_custom_call.1
= control target key start
LH: loop header
LB: loop body
LE: loop exit
PB: predicated region body
PF: predicated region fallthrough
CT: control target
= control target key end

     0   :  { %7 = vsyncpa [#allocation5], 0  ;;  %s432_s0 = inlined_call_operand.hbm [shape: f32[16,32], index: 0, kind: input, shape index: {}]   ;;  %s433_s1 = inlined_call_operand.hbm [shape: f32[16,32], index: 1, kind: input, shape index: {}]   ;;  %s434_s2 = inlined_call_operand.vmem [shape: f32[16,1], index: 2, kind: output, shape index: {}]  }
   0x1   :  { %8 = vsyncpa [#allocation7], 0  ;;  %s360_s9 = smov [#allocation4]   ;;  %s312_s13 = scalar_lea.hbm %s432_s0, 256 }
   0x2   :  { %s14_s10 = sshll.u32 %s360_s9, 4  ;;  %p313_p0 = scmp.ne.s32.totalorder %s432_s0, %s312_s13  ;;  %s15_s10 = int_to_ptr.vmem [resolvable:$true] %s14_s10 }
   0x3   :  { %p316_p1 = scmp.lt.u32.totalorder %s312_s13, %s432_s0 }
   0x5   :  { %p318_p2 = pnand %p316_p1, %p313_p0 }
   0x7   :  { %321 = shalt.err (!%p318_p2)
}
   0x8   :  { %s322_s18 = scalar_lea.vmem %s15_s10, 256  ;;  %p327_p4 = scmp.lt.s32.totalorder %s15_s10, %s15_s10 }
   0x9   :  { %p323_p3 = scmp.ne.s32.totalorder %s15_s10, %s322_s18  ;;  %p328_p5 = scmp.lt.s32.totalorder %s322_s18, %s322_s18 }
   0xb   :  { %p329_p6 = por %p328_p5, %p327_p4 }
   0xd   :  { %p330_p7 = pnand %p329_p6, %p323_p3 }
   0xf   :  { %333 = shalt.err (!%p330_p7)
}
  0x10   :  { %s361_s19 = smov 128   ;;  %s362_s20 = smov 8  }
  0x11   :  { %20 = dma.hbm_to_vmem [thread:$0]  %s432_s0, 256, %s15_s10, [#allocation5], %s361_s19, %s361_s19, %s362_s20  }
  0x12   :  { %s363_s23 = smov [#allocation6]   ;;  %s334_s27 = scalar_lea.hbm %s433_s1, 256 }
  0x13   :  { %s26_s24 = sshll.u32 %s363_s23, 4  ;;  %p335_p8 = scmp.ne.s32.totalorder %s433_s1, %s334_s27  ;;  %s27_s24 = int_to_ptr.vmem [resolvable:$true] %s26_s24 }
  0x14   :  { %p338_p9 = scmp.lt.u32.totalorder %s334_s27, %s433_s1 }
  0x16   :  { %p340_p10 = pnand %p338_p9, %p335_p8 }
  0x18   :  { %343 = shalt.err (!%p340_p10)
}
  0x19   :  { %s344_s4 = scalar_lea.vmem %s27_s24, 256  ;;  %p349_p12 = scmp.lt.s32.totalorder %s27_s24, %s27_s24 }
  0x1a   :  { %p345_p11 = scmp.ne.s32.totalorder %s27_s24, %s344_s4  ;;  %p350_p13 = scmp.lt.s32.totalorder %s344_s4, %s344_s4 }
  0x1c   :  { %p351_p0 = por %p350_p13, %p349_p12 }
  0x1e   :  { %p352_p1 = pnand %p351_p0, %p345_p11 }
  0x20   :  { %355 = shalt.err (!%p352_p1)
}
  0x21   :  { %32 = dma.hbm_to_vmem [thread:$0]  %s433_s1, 256, %s27_s24, [#allocation7], %s361_s19, %s361_s19, %s362_s20  }
  0x22   :  { %356 = dma.done.wait [#allocation5], 256  }
  0x23   :  { %357 = vsyncadd [#allocation5], 4294967040 }
  0x24   :  { %358 = dma.done.wait [#allocation7], 256  }
  0x25   :  { %359 = vsyncadd [#allocation7], 4294967040  ;;  %v50_v0 = vld [vmem:[#allocation6] sm:$0xff]  ;;  %vm54_vm0 = vcmask 261120   ;;  %v51_v1 = vld [vmem:[#allocation6 + $0x8] sm:$0xff]  ;;  %vm43_vm2 = vcmask 7168   ;;  %v175_v30 = vlaneseq }
  0x26   :  { %v48_v2 = vld [vmem:[#allocation4] sm:$0xff]  ;;  %v67_v3 = vmul.f32 %v50_v0, %v50_v0  ;;  %v68_v4 = vmul.f32 %v51_v1, %v51_v1  ;;  %v49_v6 = vld [vmem:[#allocation4 + $0x8] sm:$0xff]  ;;  %vm282_vm1 = vmpackc.low %vm54_vm0, %vm54_vm0  ;;  %v364_v29 = vmov 0.0   ;;  %vm192_vm4 = vcmask 130048  }
  0x27   :  { %v52_v5 = vmul.f32 %v48_v2, %v48_v2  ;;  %v53_v7 = vmul.f32 %v49_v6, %v49_v6  ;;  %45 = vst.msk [vmem:[#allocation2 + $0x8] sm:$0xff] %vm43_vm2, %v364_v29  ;;  %44 = vst.msk [vmem:[#allocation2] sm:$0xff] %vm43_vm2, %v364_v29  ;;  %v176_v36 = vshrl.u32 %v175_v30, 7  ;;  %v183_v39 = vand.u32 127, %v175_v30 }
  0x28   :  { %v69_v8 = vsel %vm54_vm0, %v67_v3, 0.0  ;;  %v72_v10 = vsel %vm54_vm0, %v68_v4, 0.0  ;;  %46 = vst.msk [vmem:[#allocation3] sm:$0xff] %vm43_vm2, %v364_v29  ;;  %47 = vst.msk [vmem:[#allocation3 + $0x8] sm:$0xff] %vm43_vm2, %v364_v29 }
  0x29   :  { %v55_v9 = vsel %vm54_vm0, %v52_v5, 0.0  ;;  %70 = vadd.xlane.f32.xlu0 %v69_v8  ;;  %v58_v11 = vsel %vm54_vm0, %v53_v7, 0.0  ;;  %v177_v38 = vadd.s32 8, %v176_v36  ;;  %v222_v41 = vand.u32 7, %v183_v39 }
  0x2a   :  { %56 = vadd.xlane.f32.xlu1 %v55_v9  ;;  %v208_v42 = vand.u32 7, %v176_v36  ;;  %vm186_vm5 = vcmp.eq.s32.totalorder %v176_v36, %v183_v39 }
  0x2b   :  { %v215_v40 = vand.u32 7, %v177_v38  ;;  %vm187_vm3 = vcmp.eq.s32.totalorder %v177_v38, %v183_v39 }
  0x2c   :  { %vm225_vm7 = vcmp.eq.s32.totalorder %v208_v42, %v222_v41 }
  0x2d   :  { %73 = vadd.xlane.f32.xlu0 %v72_v10  ;;  %vm226_vm6 = vcmp.eq.s32.totalorder %v215_v40, %v222_v41 }
  0x2e   :  { %59 = vadd.xlane.f32.xlu1 %v58_v11  ;;  %v191_v53 = vld [vmem:[#allocation2 + $0x8] sm:$0xff]  ;;  %v190_v54 = vld [vmem:[#allocation2] sm:$0xff] }
  0x2f   :  { %v228_v59 = vld [vmem:[#allocation3 + $0x8] sm:$0xff]  ;;  %v227_v60 = vld [vmem:[#allocation3] sm:$0xff] }
  0xb6   :  { %v71_v12 = vpop.xlane.xlu0 %70 }
  0xb7   :  { %v57_v13 = vpop.xlane.xlu1 %56  ;;  %v75_v14 = vmax.f32 %v71_v12, 1e-24 }
  0xb8   :  { %v61_v15 = vmax.f32 %v57_v13, 1e-24 }
  0xba   :  { %v74_v16 = vpop.xlane.xlu0 %73  ;;  %292 = vrsqrt.f32 %v61_v15 }
  0xbb   :  { %294 = vrsqrt.f32 %v75_v14  ;;  %v76_v17 = vmax.f32 %v74_v16, 1e-24  ;;  %v60_v18 = vpop.xlane.xlu1 %59 }
  0xbc   :  { %v62_v19 = vmax.f32 %v60_v18, 1e-24 }
  0xbd   :  { %296 = vrsqrt.f32 %v76_v17 }
  0xbe   :  { %298 = vrsqrt.f32 %v62_v19 }
  0xc4   :  { %v293_v20 = vpop.eup %292 }
  0xc5   :  { %v295_v21 = vpop.eup %294  ;;  %v65_v22 = vmul.f32 %v293_v20, %v48_v2 }
  0xc6   :  { %v79_v24 = vmul.f32 %v295_v21, %v50_v0 }
  0xc7   :  { %v297_v23 = vpop.eup %296  ;;  %278 = vmatprep.mubr.msk.f32.mxu0 %vm54_vm0, %v65_v22 }
  0xc8   :  { %v80_v25 = vmul.f32 %v297_v23, %v51_v1  ;;  %v299_v27 = vpop.eup %298 }
  0xc9   :  { %v66_v28 = vmul.f32 %v299_v27, %v49_v6 }
  0xca   :  { %v281_v26 = vpack.c.bf16 %v80_v25, %v79_v24 }
  0xcc   :  { %283 = vmatprep.subr.msk.bf16.mxu0 %vm282_vm1, %v281_v26 }
  0xcd   :  { %286 = vmatpush3.bf16.xpose.msk.msra.mxu0 %vm282_vm1, %v281_v26 }
  0xd4   :  { %279 = vmatmul.mubr.msk.f32.vlgmr.msra.gmra.mrb[0].mxu0 %vm54_vm0, %v66_v28 }
 0x1a7   :  { %v280_v31 = vpop.f32.mrb[0].mxu0 }
 0x1a8   :  { %v169_v32 = vmul.f32 4.5454545, %v280_v31  ;;  %v159_v33 = vpop.f32.mrb[1].mxu0 }
 0x1a9   :  { %v168_v34 = vmul.f32 4.5454545, %v159_v33 }
 0x1aa   :  { %v172_v35 = vmul.f32 1.442695, %v169_v32 }
 0x1ab   :  { %v170_v37 = vmul.f32 1.442695, %v168_v34 }
 0x1ac   :  { %300 = vpow2.f32 %v172_v35 }
 0x1ad   :  { %302 = vpow2.f32 %v170_v37 }
 0x1b6   :  { %v301_v43 = vpop.eup %300 }
 0x1b7   :  { %v303_v44 = vpop.eup %302  ;;  %v189_v45 = vsel %vm187_vm3, 0.0, %v301_v43 }
 0x1b8   :  { %v196_v46 = vsel %vm192_vm4, %v189_v45, 0.0  ;;  %v188_v47 = vsel %vm186_vm5, 0.0, %v303_v44  ;;  %v230_v49 = vsel %vm226_vm6, %v189_v45, 0.0 }
 0x1b9   :  { %197 = vadd.xlane.f32.xlu1 %v196_v46  ;;  %v193_v48 = vsel %vm192_vm4, %v188_v47, 0.0  ;;  %v229_v50 = vsel %vm225_vm7, %v188_v47, 0.0  ;;  %v234_v51 = vsel %vm192_vm4, %v230_v49, 0.0 }
 0x1ba   :  { %194 = vadd.xlane.f32.xlu0 %v193_v48  ;;  %v231_v52 = vsel %vm192_vm4, %v229_v50, 0.0 }
 0x1bd   :  { %235 = vadd.xlane.f32.xlu1 %v234_v51 }
 0x1be   :  { %232 = vadd.xlane.f32.xlu0 %v231_v52 }
 0x246   :  { %v198_v55 = vpop.xlane.xlu1 %197 }
 0x247   :  { %v200_v56 = vadd.f32 %v198_v55, %v191_v53  ;;  %v195_v57 = vpop.xlane.xlu0 %194 }
 0x248   :  { %v199_v58 = vadd.f32 %v195_v57, %v190_v54 }
 0x249   :  { %203 = vst.msk [vmem:[#allocation2 + $0x8] sm:$0xff] %vm43_vm2, %v200_v56 }
 0x24a   :  { %202 = vst.msk [vmem:[#allocation2] sm:$0xff] %vm43_vm2, %v199_v58  ;;  %v236_v61 = vpop.xlane.xlu1 %235 }
 0x24b   :  { %v238_v62 = vadd.f32 %v236_v61, %v228_v59  ;;  %v233_v63 = vpop.xlane.xlu0 %232 }
 0x24c   :  { %v237_v0 = vadd.f32 %v233_v63, %v227_v60 }
 0x24d   :  { %240 = vst.msk [vmem:[#allocation3 + $0x8] sm:$0xff] %vm43_vm2, %v238_v62 }
 0x24e   :  { %239 = vst.msk [vmem:[#allocation3] sm:$0xff] %vm43_vm2, %v237_v0 }
 0x250   :  { %v251_v1 = vld [vmem:[#allocation2 + $0x8] sm:$0xff] }
 0x251   :  { %v250_v2 = vld [vmem:[#allocation2] sm:$0xff]  ;;  %304 = vlog2.f32 %v251_v1 }
 0x252   :  { %306 = vlog2.f32 %v250_v2 }
 0x254   :  { %v245_v3 = vld [vmem:[#allocation3 + $0x8] sm:$0xff] }
 0x255   :  { %308 = vlog2.f32 %v245_v3  ;;  %v244_v4 = vld [vmem:[#allocation3] sm:$0xff] }
 0x256   :  { %310 = vlog2.f32 %v244_v4 }
 0x25b   :  { %v305_v5 = vpop.eup %304 }
 0x25c   :  { %v307_v6 = vpop.eup %306  ;;  %v255_v9 = vmul.f32 0.6931472, %v305_v5 }
 0x25d   :  { %v253_v11 = vmul.f32 0.6931472, %v307_v6 }
 0x25f   :  { %v309_v7 = vpop.eup %308 }
 0x260   :  { %v311_v8 = vpop.eup %310  ;;  %v249_v10 = vmul.f32 0.6931472, %v309_v7 }
 0x261   :  { %v247_v12 = vmul.f32 0.6931472, %v311_v8 }
 0x262   :  { %v257_v13 = vsub.f32 %v249_v10, %v255_v9 }
 0x263   :  { %v256_v14 = vsub.f32 %v247_v12, %v253_v11 }
 0x264   :  { %259 = vst.msk [vmem:[%s434_s2 + $0x8] sm:$0xff] %vm43_vm2, %v257_v13 }
 0x265   :  { %258 = vst.msk [vmem:[%s434_s2] sm:$0xff] %vm43_vm2, %v256_v14 }
 0x266   :  { %264 = vsyncpa [#allocation5], 1 }
 0x267   :  { %265 = vsyncpa [#allocation7], 1 }

</bundles_post_ra>
